<compile_context>
chip_gen: v7x
topology: tpu7x:2x2x1
jax: 0.10.0
libtpu: 0.0.40
codegen_flags: <defaults>
</compile_context>

<pallas_src>
import functools

import jax
import jax.numpy as jnp
from jax.experimental import pallas as pl
from jax.experimental.pallas import tpu as pltpu


def prediction_mlp_kernel(x_ref, w1_ref, gamma_ref, beta_ref, w2_ref, b2_ref,
                          o_ref, sum_ref, sumsq_ref, scale_ref, shift_ref,
                          *h_cache, batch, block_b, eps=1e-5):
    cache_h = bool(h_cache)
    h_ref = h_cache[0] if cache_h else None

    phase = pl.program_id(0)
    b = pl.program_id(1)
    nb = pl.num_programs(1)

    # ---- phase 0, first tile: zero the statistics accumulators ----
    @pl.when(jnp.logical_and(phase == 0, b == 0))
    def _init():
        sum_ref[...] = jnp.zeros_like(sum_ref)
        sumsq_ref[...] = jnp.zeros_like(sumsq_ref)

    # ---- phase 0: matmul1 + accumulate per-column sum / sum-of-squares ----
    @pl.when(phase == 0)
    def _stats():
        h = jnp.dot(x_ref[...], w1_ref[...],
                    preferred_element_type=jnp.float32)       # [tb, H] f32
        if cache_h:
            row = pl.multiple_of(b * block_b, block_b)
            h_ref[pl.ds(row, block_b), :] = h                 # keep h for phase 1
        sum_ref[...] += jnp.sum(h, axis=0, keepdims=True)
        sumsq_ref[...] += jnp.sum(h * h, axis=0, keepdims=True)

    # ---- phase 0, last tile: fold BN into fused scale/shift ----
    @pl.when(jnp.logical_and(phase == 0, b == nb - 1))
    def _finalize():
        inv_n = jnp.float32(1.0 / batch)
        mean = sum_ref[...] * inv_n                            # [1, H]
        ex2 = sumsq_ref[...] * inv_n
        var = jnp.maximum(ex2 - mean * mean, 0.0)              # biased var
        inv_std = jax.lax.rsqrt(var + eps)                     # EUP
        scale = gamma_ref[...] * inv_std
        scale_ref[...] = scale
        shift_ref[...] = beta_ref[...] - mean * scale

    # ---- phase 1: normalize + ReLU + second matmul (+ bias) ----
    @pl.when(phase == 1)
    def _apply():
        if cache_h:
            row = pl.multiple_of(b * block_b, block_b)
            h = h_ref[pl.ds(row, block_b), :]                  # [tb, H] f32
        else:
            h = jnp.dot(x_ref[...], w1_ref[...],
                        preferred_element_type=jnp.float32)    # recompute
        h = jnp.maximum(h * scale_ref[...] + shift_ref[...], 0.0)
        out = jnp.dot(h.astype(w2_ref.dtype), w2_ref[...],
                      preferred_element_type=jnp.float32)      # [tb, Dout]
        o_ref[...] = (out + b2_ref[...]).astype(o_ref.dtype)


def prediction_mlp(x, w1, gamma, beta, w2, b2, *, block_b=None,
                   h_cache_budget_bytes=8 << 20):
    """x: [B, Din]; w1: [Din, H]; gamma/beta: [1, H]; w2: [H, Dout]; b2: [1, Dout]."""
    B, Din = x.shape
    H = w1.shape[1]
    Dout = w2.shape[1]

    # Pick a batch-tile size that divides B (multiples of 8 for sublane align).
    if block_b is None:
        block_b = B
        for cand in (256, 128, 64, 32, 16, 8):
            if cand < B and B % cand == 0:
                block_b = cand
                break
    assert B % block_b == 0, "batch must be divisible by the B-tile"
    nb = B // block_b

    # Cache the full hidden activation in VMEM when it is cheap to do so:
    # matmul1 then runs only once and x is not re-streamed in phase 1.
    cache_h = (B * H * 4) <= h_cache_budget_bytes

    # bf16 operands for the MXU; f32 accumulation inside the kernel.
    x_bf = x.astype(jnp.bfloat16)
    w1_bf = w1.astype(jnp.bfloat16)
    w2_bf = w2.astype(jnp.bfloat16)
    gamma2 = gamma.reshape(1, H).astype(jnp.float32)
    beta2 = beta.reshape(1, H).astype(jnp.float32)
    b2_2 = b2.reshape(1, Dout).astype(jnp.float32)

    # VMEM budget: resident weights + double-buffered x/out tiles + scratch.
    footprint = (
        2 * Din * H * 2 + 2 * H * Dout * 2          # weights (bf16, x2 safety)
        + 2 * block_b * Din * 2                     # x tile, double-buffered
        + 2 * block_b * Dout * 4                    # out tile, double-buffered
        + 3 * block_b * H * 4                       # h temporaries
        + 8 * H * 4 + 2 * Dout * 4                  # stats/scale/shift + vecs
        + (B * H * 4 if cache_h else 0)             # h cache (single-buffered)
    )
    vmem_limit = int(min(max(2 * footprint, 16 << 20), 48 << 20))

    kernel = functools.partial(prediction_mlp_kernel, batch=B, block_b=block_b)

    mm1_passes = 1 if cache_h else 2
    flops = mm1_passes * 2 * B * Din * H + 2 * B * H * Dout
    bytes_accessed = (mm1_passes * B * Din * 2 + Din * H * 2 + H * Dout * 2
                      + B * Dout * 4 + 3 * H * 4 + Dout * 4)

    if cache_h:
        # Phase 1 never reads x: keep the last-fetched block resident so no
        # extra HBM traffic happens while the cached h is consumed.
        x_index = lambda p, b: (b * (1 - p) + (nb - 1) * p, 0)
    else:
        x_index = lambda p, b: (b, 0)

    scratch_shapes = [
        pltpu.VMEM((1, H), jnp.float32),   # sum(h)
        pltpu.VMEM((1, H), jnp.float32),   # sum(h*h)
        pltpu.VMEM((1, H), jnp.float32),   # fused BN scale
        pltpu.VMEM((1, H), jnp.float32),   # fused BN shift
    ]
    if cache_h:
        scratch_shapes.append(pltpu.VMEM((B, H), jnp.float32))   # h cache

    return pl.pallas_call(
        kernel,
        out_shape=jax.ShapeDtypeStruct((B, Dout), jnp.float32),
        grid_spec=pltpu.PrefetchScalarGridSpec(
            num_scalar_prefetch=0,
            grid=(2, nb),                                       # (phase, b_tile)
            in_specs=[
                pl.BlockSpec((block_b, Din), x_index),               # x
                pl.BlockSpec((Din, H), lambda p, b: (0, 0)),         # w1 (resident)
                pl.BlockSpec((1, H), lambda p, b: (0, 0)),           # gamma
                pl.BlockSpec((1, H), lambda p, b: (0, 0)),           # beta
                pl.BlockSpec((H, Dout), lambda p, b: (0, 0)),        # w2 (resident)
                pl.BlockSpec((1, Dout), lambda p, b: (0, 0)),        # b2
            ],
            # During phase 0 the output block index stays 0, so no unwritten
            # block is ever flushed; phase 1 writes every block exactly once.
            out_specs=pl.BlockSpec((block_b, Dout), lambda p, b: (p * b, 0)),
            scratch_shapes=scratch_shapes,
        ),
        compiler_params=pltpu.CompilerParams(
            dimension_semantics=("arbitrary", "arbitrary"),
            vmem_limit_bytes=vmem_limit,
        ),
        cost_estimate=pl.CostEstimate(
            flops=flops, bytes_accessed=bytes_accessed, transcendentals=H),
    )(x_bf, w1_bf, gamma2, beta2, w2_bf, b2_2)


def init_params(key, input_dim, hidden_dim, output_dim):
    """Deterministic synthetic init (Kaiming-uniform-ish, like nn.Linear default)."""
    k1, k2, k3 = jax.random.split(key, 3)
    bound1 = 1.0 / jnp.sqrt(input_dim)
    bound2 = 1.0 / jnp.sqrt(hidden_dim)
    w1 = jax.random.uniform(k1, (input_dim, hidden_dim), jnp.float32,
                            -bound1, bound1)
    w2 = jax.random.uniform(k2, (hidden_dim, output_dim), jnp.float32,
                            -bound2, bound2)
    b2 = jax.random.uniform(k3, (1, output_dim), jnp.float32, -bound2, bound2)
    gamma = jnp.ones((1, hidden_dim), jnp.float32)   # BatchNorm1d weight init
    beta = jnp.zeros((1, hidden_dim), jnp.float32)   # BatchNorm1d bias init
    return w1, gamma, beta, w2, b2


def reference_mlp(x, w1, gamma, beta, w2, b2, eps=1e-5):
    """Plain-JAX reference mirroring PyTorch training-mode forward."""
    h = x @ w1
    mean = jnp.mean(h, axis=0, keepdims=True)
    var = jnp.mean((h - mean) ** 2, axis=0, keepdims=True)
    h = (h - mean) / jnp.sqrt(var + eps) * gamma + beta
    h = jnp.maximum(h, 0.0)
    return h @ w2 + b2


if __name__ == "__main__":
    # Small but lane-dense demo shapes (multiples of 128 on the feature dims).
    input_dim, hidden_dim, output_dim = 128, 128, 128
    batch = 32                                    # -> 2 batch tiles of 16

    key = jax.random.PRNGKey(0)
    kx, kp = jax.random.split(key)
    x = jax.random.normal(kx, (batch, input_dim), jnp.float32)
    w1, gamma, beta, w2, b2 = init_params(kp, input_dim, hidden_dim, output_dim)

    out = prediction_mlp(x, w1, gamma, beta, w2, b2)
    out = jax.block_until_ready(out)

    # Reference with the same bf16 rounding of matmul operands (f32 math).
    xb = x.astype(jnp.bfloat16).astype(jnp.float32)
    w1b = w1.astype(jnp.bfloat16).astype(jnp.float32)
    w2b = w2.astype(jnp.bfloat16).astype(jnp.float32)
    ref = reference_mlp(xb, w1b, gamma, beta, w2b, b2)

    assert out.shape == (batch, output_dim)
    assert jnp.allclose(out, ref, atol=3e-2, rtol=3e-2), "mismatch vs reference"

    # TODO(synk): BatchNorm1d running_mean/running_var buffer updates (a
    # training-mode side effect) are not produced; only the forward output is.

    print("KERNEL_OK")
</pallas_src>

<mosaic_0001>
module attributes {stable_mosaic.version = 11 : i64} {
  func.func @prediction_mlp_kernel(%arg0: i32, %arg1: i32, %arg2: memref<16x128xbf16, #tpu.memory_space<vmem>>, %arg3: memref<128x128xbf16, #tpu.memory_space<vmem>>, %arg4: memref<1x128xf32, #tpu.memory_space<vmem>>, %arg5: memref<1x128xf32, #tpu.memory_space<vmem>>, %arg6: memref<128x128xbf16, #tpu.memory_space<vmem>>, %arg7: memref<1x128xf32, #tpu.memory_space<vmem>>, %arg8: memref<16x128xf32, #tpu.memory_space<vmem>>, %arg9: memref<1x128xf32, #tpu.memory_space<vmem>>, %arg10: memref<1x128xf32, #tpu.memory_space<vmem>>, %arg11: memref<1x128xf32, #tpu.memory_space<vmem>>, %arg12: memref<1x128xf32, #tpu.memory_space<vmem>>, %arg13: memref<32x128xf32, #tpu.memory_space<vmem>>) attributes {dimension_semantics = [#tpu.dimension_semantics<arbitrary>, #tpu.dimension_semantics<arbitrary>], iteration_bounds = array<i64: 2, 2>, scalar_prefetch = 0 : i64, scratch_operands = 5 : i64, tpu.core_type = #tpu.core_type<tc>, window_params = [{transform_indices = @transform_0, window_bounds = array<i64: 16, 128>}, {pipeline_mode = #tpu.pipeline_mode<synchronous>, transform_indices = @transform_1, window_bounds = array<i64: 128, 128>}, {pipeline_mode = #tpu.pipeline_mode<synchronous>, transform_indices = @transform_2, window_bounds = array<i64: 1, 128>}, {pipeline_mode = #tpu.pipeline_mode<synchronous>, transform_indices = @transform_3, window_bounds = array<i64: 1, 128>}, {pipeline_mode = #tpu.pipeline_mode<synchronous>, transform_indices = @transform_4, window_bounds = array<i64: 128, 128>}, {pipeline_mode = #tpu.pipeline_mode<synchronous>, transform_indices = @transform_5, window_bounds = array<i64: 1, 128>}, {transform_indices = @transform_6, window_bounds = array<i64: 16, 128>}]} {
    %c0_i32 = arith.constant 0 : i32
    %0 = arith.cmpi eq, %arg0, %c0_i32 : i32
    %c0_i32_0 = arith.constant 0 : i32
    %1 = arith.cmpi eq, %arg1, %c0_i32_0 : i32
    %2 = arith.andi %0, %1 : i1
    %3 = arith.extui %2 : i1 to i32
    %c0_i32_1 = arith.constant 0 : i32
    %4 = arith.cmpi ne, %3, %c0_i32_1 : i32
    scf.if %4 {
      %cst = arith.constant 0.000000e+00 : f32
      %16 = vector.broadcast %cst : f32 to vector<1x128xf32>
      %c0 = arith.constant 0 : index
      %c0_8 = arith.constant 0 : index
      %17 = vector.load %arg9[%c0, %c0_8] : memref<1x128xf32, #tpu.memory_space<vmem>>, vector<1x128xf32>
      tpu.vector_store %arg9[%c0, %c0_8], %16 {strides = array<i32>} : memref<1x128xf32, #tpu.memory_space<vmem>>, vector<1x128xf32>,
      %cst_9 = arith.constant 0.000000e+00 : f32
      %18 = vector.broadcast %cst_9 : f32 to vector<1x128xf32>
      %c0_10 = arith.constant 0 : index
      %c0_11 = arith.constant 0 : index
      %19 = vector.load %arg10[%c0_10, %c0_11] : memref<1x128xf32, #tpu.memory_space<vmem>>, vector<1x128xf32>
      tpu.vector_store %arg10[%c0_10, %c0_11], %18 {strides = array<i32>} : memref<1x128xf32, #tpu.memory_space<vmem>>, vector<1x128xf32>,
    } else {
    }
    %c0_i32_2 = arith.constant 0 : i32
    %5 = arith.cmpi eq, %arg0, %c0_i32_2 : i32
    %6 = arith.extui %5 : i1 to i32
    %c0_i32_3 = arith.constant 0 : i32
    %7 = arith.cmpi ne, %6, %c0_i32_3 : i32
    scf.if %7 {
      %c0 = arith.constant 0 : index
      %c0_8 = arith.constant 0 : index
      %16 = vector.load %arg2[%c0, %c0_8] : memref<16x128xbf16, #tpu.memory_space<vmem>>, vector<16x128xbf16>
      %c0_9 = arith.constant 0 : index
      %c0_10 = arith.constant 0 : index
      %17 = vector.load %arg3[%c0_9, %c0_10] : memref<128x128xbf16, #tpu.memory_space<vmem>>, vector<128x128xbf16>
      %cst = arith.constant dense<0.000000e+00> : vector<16x128xf32>
      %18 = tpu.matmul %16, %17, %cst {dimension_numbers = #tpu.dot_dimension_numbers<[1], [0], [0], [1], [0, 0, 1, 1], [], []>} : vector<16x128xbf16>, vector<128x128xbf16>, vector<16x128xf32> -> vector<16x128xf32>
      %c16_i32 = arith.constant 16 : i32
      %19 = arith.muli %arg1, %c16_i32 : i32
      %20 = tpu.assume_multiple %19, 16 : i32
      %21 = arith.index_cast %20 : i32 to index
      %c0_11 = arith.constant 0 : index
      %22 = vector.load %arg13[%21, %c0_11] : memref<32x128xf32, #tpu.memory_space<vmem>>, vector<16x128xf32>
      tpu.vector_store %arg13[%21, %c0_11], %18 {strides = array<i32>} : memref<32x128xf32, #tpu.memory_space<vmem>>, vector<16x128xf32>,
      %c0_12 = arith.constant 0 : index
      %c0_13 = arith.constant 0 : index
      %23 = vector.load %arg9[%c0_12, %c0_13] : memref<1x128xf32, #tpu.memory_space<vmem>>, vector<1x128xf32>
      %cst_14 = arith.constant dense<0.000000e+00> : vector<128xf32>
      %24 = vector.multi_reduction <add>, %18, %cst_14 [0] : vector<16x128xf32> to vector<128xf32>
      %25 = vector.shape_cast %24 : vector<128xf32> to vector<1x128xf32>
      %26 = arith.addf %23, %25 : vector<1x128xf32>
      %c0_15 = arith.constant 0 : index
      %c0_16 = arith.constant 0 : index
      %27 = vector.load %arg9[%c0_15, %c0_16] : memref<1x128xf32, #tpu.memory_space<vmem>>, vector<1x128xf32>
      tpu.vector_store %arg9[%c0_15, %c0_16], %26 {strides = array<i32>} : memref<1x128xf32, #tpu.memory_space<vmem>>, vector<1x128xf32>,
      %c0_17 = arith.constant 0 : index
      %c0_18 = arith.constant 0 : index
      %28 = vector.load %arg10[%c0_17, %c0_18] : memref<1x128xf32, #tpu.memory_space<vmem>>, vector<1x128xf32>
      %29 = arith.mulf %18, %18 : vector<16x128xf32>
      %cst_19 = arith.constant dense<0.000000e+00> : vector<128xf32>
      %30 = vector.multi_reduction <add>, %29, %cst_19 [0] : vector<16x128xf32> to vector<128xf32>
      %31 = vector.shape_cast %30 : vector<128xf32> to vector<1x128xf32>
      %32 = arith.addf %28, %31 : vector<1x128xf32>
      %c0_20 = arith.constant 0 : index
      %c0_21 = arith.constant 0 : index
      %33 = vector.load %arg10[%c0_20, %c0_21] : memref<1x128xf32, #tpu.memory_space<vmem>>, vector<1x128xf32>
      tpu.vector_store %arg10[%c0_20, %c0_21], %32 {strides = array<i32>} : memref<1x128xf32, #tpu.memory_space<vmem>>, vector<1x128xf32>,
    } else {
    }
    %c0_i32_4 = arith.constant 0 : i32
    %8 = arith.cmpi eq, %arg0, %c0_i32_4 : i32
    %c1_i32 = arith.constant 1 : i32
    %9 = arith.cmpi eq, %arg1, %c1_i32 : i32
    %10 = arith.andi %8, %9 : i1
    %11 = arith.extui %10 : i1 to i32
    %c0_i32_5 = arith.constant 0 : i32
    %12 = arith.cmpi ne, %11, %c0_i32_5 : i32
    scf.if %12 {
      %c0 = arith.constant 0 : index
      %c0_8 = arith.constant 0 : index
      %16 = vector.load %arg9[%c0, %c0_8] : memref<1x128xf32, #tpu.memory_space<vmem>>, vector<1x128xf32>
      %cst = arith.constant 3.125000e-02 : f32
      %17 = vector.broadcast %cst : f32 to vector<1x128xf32>
      %18 = arith.mulf %16, %17 : vector<1x128xf32>
      %c0_9 = arith.constant 0 : index
      %c0_10 = arith.constant 0 : index
      %19 = vector.load %arg10[%c0_9, %c0_10] : memref<1x128xf32, #tpu.memory_space<vmem>>, vector<1x128xf32>
      %cst_11 = arith.constant 3.125000e-02 : f32
      %20 = vector.broadcast %cst_11 : f32 to vector<1x128xf32>
      %21 = arith.mulf %19, %20 : vector<1x128xf32>
      %22 = arith.mulf %18, %18 : vector<1x128xf32>
      %23 = arith.subf %21, %22 : vector<1x128xf32>
      %cst_12 = arith.constant 0.000000e+00 : f32
      %24 = vector.broadcast %cst_12 : f32 to vector<1x128xf32>
      %25 = arith.maximumf %23, %24 : vector<1x128xf32>
      %cst_13 = arith.constant 9.99999974E-6 : f32
      %26 = vector.broadcast %cst_13 : f32 to vector<1x128xf32>
      %27 = arith.addf %25, %26 : vector<1x128xf32>
      %28 = math.rsqrt %27 : vector<1x128xf32>
      %c0_14 = arith.constant 0 : index
      %c0_15 = arith.constant 0 : index
      %29 = vector.load %arg4[%c0_14, %c0_15] : memref<1x128xf32, #tpu.memory_space<vmem>>, vector<1x128xf32>
      %30 = arith.mulf %29, %28 : vector<1x128xf32>
      %c0_16 = arith.constant 0 : index
      %c0_17 = arith.constant 0 : index
      %31 = vector.load %arg11[%c0_16, %c0_17] : memref<1x128xf32, #tpu.memory_space<vmem>>, vector<1x128xf32>
      tpu.vector_store %arg11[%c0_16, %c0_17], %30 {strides = array<i32>} : memref<1x128xf32, #tpu.memory_space<vmem>>, vector<1x128xf32>,
      %c0_18 = arith.constant 0 : index
      %c0_19 = arith.constant 0 : index
      %32 = vector.load %arg5[%c0_18, %c0_19] : memref<1x128xf32, #tpu.memory_space<vmem>>, vector<1x128xf32>
      %33 = arith.mulf %18, %30 : vector<1x128xf32>
      %34 = arith.subf %32, %33 : vector<1x128xf32>
      %c0_20 = arith.constant 0 : index
      %c0_21 = arith.constant 0 : index
      %35 = vector.load %arg12[%c0_20, %c0_21] : memref<1x128xf32, #tpu.memory_space<vmem>>, vector<1x128xf32>
      tpu.vector_store %arg12[%c0_20, %c0_21], %34 {strides = array<i32>} : memref<1x128xf32, #tpu.memory_space<vmem>>, vector<1x128xf32>,
    } else {
    }
    %c1_i32_6 = arith.constant 1 : i32
    %13 = arith.cmpi eq, %arg0, %c1_i32_6 : i32
    %14 = arith.extui %13 : i1 to i32
    %c0_i32_7 = arith.constant 0 : i32
    %15 = arith.cmpi ne, %14, %c0_i32_7 : i32
    scf.if %15 {
      %c16_i32 = arith.constant 16 : i32
      %16 = arith.muli %arg1, %c16_i32 : i32
      %17 = tpu.assume_multiple %16, 16 : i32
      %18 = arith.index_cast %17 : i32 to index
      %c0 = arith.constant 0 : index
      %19 = vector.load %arg13[%18, %c0] : memref<32x128xf32, #tpu.memory_space<vmem>>, vector<16x128xf32>
      %c0_8 = arith.constant 0 : index
      %c0_9 = arith.constant 0 : index
      %20 = vector.load %arg11[%c0_8, %c0_9] : memref<1x128xf32, #tpu.memory_space<vmem>>, vector<1x128xf32>
      %21 = vector.broadcast %20 : vector<1x128xf32> to vector<16x128xf32>
      %22 = arith.mulf %19, %21 : vector<16x128xf32>
      %c0_10 = arith.constant 0 : index
      %c0_11 = arith.constant 0 : index
      %23 = vector.load %arg12[%c0_10, %c0_11] : memref<1x128xf32, #tpu.memory_space<vmem>>, vector<1x128xf32>
      %24 = vector.broadcast %23 : vector<1x128xf32> to vector<16x128xf32>
      %25 = arith.addf %22, %24 : vector<16x128xf32>
      %cst = arith.constant 0.000000e+00 : f32
      %26 = vector.broadcast %cst : f32 to vector<16x128xf32>
      %27 = arith.maximumf %25, %26 : vector<16x128xf32>
      %28 = arith.truncf %27 : vector<16x128xf32> to vector<16x128xbf16>
      %c0_12 = arith.constant 0 : index
      %c0_13 = arith.constant 0 : index
      %29 = vector.load %arg6[%c0_12, %c0_13] : memref<128x128xbf16, #tpu.memory_space<vmem>>, vector<128x128xbf16>
      %cst_14 = arith.constant dense<0.000000e+00> : vector<16x128xf32>
      %30 = tpu.matmul %28, %29, %cst_14 {dimension_numbers = #tpu.dot_dimension_numbers<[1], [0], [0], [1], [0, 0, 1, 1], [], []>} : vector<16x128xbf16>, vector<128x128xbf16>, vector<16x128xf32> -> vector<16x128xf32>
      %c0_15 = arith.constant 0 : index
      %c0_16 = arith.constant 0 : index
      %31 = vector.load %arg7[%c0_15, %c0_16] : memref<1x128xf32, #tpu.memory_space<vmem>>, vector<1x128xf32>
      %32 = vector.broadcast %31 : vector<1x128xf32> to vector<16x128xf32>
      %33 = arith.addf %30, %32 : vector<16x128xf32>
      %c0_17 = arith.constant 0 : index
      %c0_18 = arith.constant 0 : index
      %34 = vector.load %arg8[%c0_17, %c0_18] : memref<16x128xf32, #tpu.memory_space<vmem>>, vector<16x128xf32>
      tpu.vector_store %arg8[%c0_17, %c0_18], %33 {strides = array<i32>} : memref<16x128xf32, #tpu.memory_space<vmem>>, vector<16x128xf32>,
    } else {
    }
    return
  }
  func.func @transform_0(%arg0: i32, %arg1: i32) -> (i32, i32) {
    %c1_i32 = arith.constant 1 : i32
    %0 = arith.subi %c1_i32, %arg0 : i32
    %1 = arith.muli %arg1, %0 : i32
    %c1_i32_0 = arith.constant 1 : i32
    %2 = arith.muli %c1_i32_0, %arg0 : i32
    %3 = arith.addi %1, %2 : i32
    %c0_i32 = arith.constant 0 : i32
    %c0_i32_1 = arith.constant 0 : i32
    return %3, %c0_i32 : i32, i32
  }
  func.func @transform_1(%arg0: i32, %arg1: i32) -> (i32, i32) {
    %c0_i32 = arith.constant 0 : i32
    %c0_i32_0 = arith.constant 0 : i32
    %c0_i32_1 = arith.constant 0 : i32
    return %c0_i32, %c0_i32_0 : i32, i32
  }
  func.func @transform_2(%arg0: i32, %arg1: i32) -> (i32, i32) {
    %c0_i32 = arith.constant 0 : i32
    %c0_i32_0 = arith.constant 0 : i32
    %c0_i32_1 = arith.constant 0 : i32
    return %c0_i32, %c0_i32_0 : i32, i32
  }
  func.func @transform_3(%arg0: i32, %arg1: i32) -> (i32, i32) {
    %c0_i32 = arith.constant 0 : i32
    %c0_i32_0 = arith.constant 0 : i32
    %c0_i32_1 = arith.constant 0 : i32
    return %c0_i32, %c0_i32_0 : i32, i32
  }
  func.func @transform_4(%arg0: i32, %arg1: i32) -> (i32, i32) {
    %c0_i32 = arith.constant 0 : i32
    %c0_i32_0 = arith.constant 0 : i32
    %c0_i32_1 = arith.constant 0 : i32
    return %c0_i32, %c0_i32_0 : i32, i32
  }
  func.func @transform_5(%arg0: i32, %arg1: i32) -> (i32, i32) {
    %c0_i32 = arith.constant 0 : i32
    %c0_i32_0 = arith.constant 0 : i32
    %c0_i32_1 = arith.constant 0 : i32
    return %c0_i32, %c0_i32_0 : i32, i32
  }
  func.func @transform_6(%arg0: i32, %arg1: i32) -> (i32, i32) {
    %0 = arith.muli %arg0, %arg1 : i32
    %c0_i32 = arith.constant 0 : i32
    %c0_i32_0 = arith.constant 0 : i32
    return %0, %c0_i32 : i32, i32
  }
}

</mosaic_0001>

<bundles_post_ra>
// kernel: tpu_custom_call.1
= control target key start
LH: loop header
LB: loop body
LE: loop exit
PB: predicated region body
PF: predicated region fallthrough
CT: control target
= control target key end

     0   :  { %s1627_s0 = inlined_call_operand.hbm [shape: bf16[32,128], index: 0, kind: input, shape index: {}]   ;;  %s1628_s1 = inlined_call_operand.hbm [shape: bf16[128,128], index: 1, kind: input, shape index: {}]   ;;  %s1629_s2 = inlined_call_operand.vmem [shape: f32[1,128], index: 2, kind: input, shape index: {}]   ;;  %s1630_s3 = inlined_call_operand.vmem [shape: f32[1,128], index: 3, kind: input, shape index: {}]   ;;  %s1631_s4 = inlined_call_operand.hbm [shape: bf16[128,128], index: 4, kind: input, shape index: {}]   ;;  %s1632_s5 = inlined_call_operand.vmem [shape: f32[1,128], index: 5, kind: input, shape index: {}]   ;;  %s1633_s6 = inlined_call_operand.hbm [shape: f32[32,128], index: 6, kind: output, shape index: {}]  }
   0x1   :  { %1648 = sst [smem:[#allocation23_spill]] %s1628_s1 }
   0x2   :  { %1649 = sst [smem:[#allocation24_spill]] %s1629_s2 }
   0x3   :  { %1650 = sst [smem:[#allocation25_spill]] %s1630_s3 }
   0x4   :  { %1651 = sst [smem:[#allocation26_spill]] %s1631_s4 }
   0x5   :  { %1652 = sst [smem:[#allocation27_spill]] %s1632_s5 }
   0x6   :  { %1653 = sst [smem:[#allocation28_spill]] %s1633_s6 }
   0x7   :  { %11 = vsyncpa [#allocation8], 0 }
   0x8   :  { %13 = vsyncpa [#allocation8 + $0x1], 0 }
   0x9   :  { %14 = vsyncpa [#allocation11], 0 }
   0xa   :  { %15 = vsyncpa [#allocation9], 0 }
   0xb   :  { %17 = vsyncpa [#allocation9 + $0x1], 0  ;;  %s1282_s21 = smov 0   ;;  %s1284_s22 = smov 0  }
   0xc   :  { %s1286_s23 = smov 0   ;;  %s1288_s24 = smov 0  }
   0xd   :  { %s1290_s25 = smov 0   ;;  %s1292_s26 = smov 0  }
   0xe   :  { %s1294_s27 = smov 0   ;;  %s1296_s28 = smov 0  }
   0xf   :  { %s1298_s29 = smov 0   ;;  %s1300_s30 = smov 0  }
  0x10   :  { %s1302_s7 = smov 0  }
  0x11 LB: > { %1654 = sst [smem:[#allocation17_spill]] %s1192_s21  ;;  %s766_s8 = sadd.s32 4294967295, %s1232_s7   ;;  %s1232_s7 = sphi %s1302_s7, %s23_s7   ;;  %s1228_s30 = sphi %s1300_s30, %s1699_s30   ;;  %s1224_s29 = sphi %s1298_s29, %s1698_s29   ;;  %s1220_s28 = sphi %s1296_s28, %s1691_s28   ;;  %s1216_s27 = sphi %s1294_s27, %s1690_s27   ;;  %s1212_s26 = sphi %s1292_s26, %s1697_s26   ;;  %s1208_s25 = sphi %s1290_s25, %s1696_s25   ;;  %s1204_s24 = sphi %s1288_s24, %s1695_s24   ;;  %s1200_s23 = sphi %s1286_s23, %s1694_s23   ;;  %s1196_s22 = sphi %s1284_s22, %s1693_s22   ;;  %s1192_s21 = sphi %s1282_s21, %s1692_s21  }
  0x12   : > { %1655 = sst [smem:[#allocation18_spill]] %s1216_s27  ;;  %s767_s9 = sadd.s32 4294967294, %s1232_s7  }
  0x13   : > { %1656 = sst [smem:[#allocation19_spill]] %s1224_s29  ;;  %p61_p0 = scmp.ne.s32.totalorder %s1208_s25, %s1204_s24 }
  0x14   : > { %1657 = sst [smem:[#allocation20_spill]] %s1228_s30  ;;  %p1338_p1 = scmp.eq.s32.totalorder %s766_s8, 0 }
  0x15   : > { %p191_p2 = scmp.ne.s32.totalorder %s1200_s23, %s1196_s22  ;;  %p192_p4 = scmp.eq.s32.totalorder %s766_s8, 3 }
  0x16   : > { %s1658_s10 = scalar_select %p1338_p1, 1, 0 }
  0x17   : > { %p1347_p3 = por %p1338_p1, %p61_p0  ;;  %p197_p5 = scmp.ne.s32.totalorder %s1196_s22, %s1192_s21 }
  0x18   : > { %p198_p6 = scmp.eq.s32.totalorder %s767_s9, 3  ;;  %p1353_p7 = por %p192_p4, %p191_p2 }
  0x19   : > { %s1659_s12 = scalar_select %p1347_p3, 1, 0 }
  0x1a   : > { %s1660_s13 = scalar_select %p1353_p7, 1, 0 }
  0x1b   : > { %p768_p8 = scmp.ge.s32.totalorder %s1232_s7, 1  ;;  %p1358_p9 = por %p198_p6, %p197_p5 }
  0x1c   : > { %1661 = sst [smem:[#allocation21_spill]] %s1660_s13  ;;  %p205_p10 = scmp.lt.s32.totalorder %s1232_s7, 5 }
  0x1d   : > { %s1662_s14 = scalar_select %p1358_p9, 1, 0 }
  0x1e   : > { %p1363_p11 = pnand %p768_p8, %p205_p10  ;;  %s1234_s16 = smov [#allocation10]  }
  0x1f   : > { %1663 = sst [smem:[#allocation22_spill]] %s1662_s14  ;;  %s217_s17 = sshll.u32 %s1234_s16, 4  ;;  %s218_s17 = int_to_ptr.vmem [resolvable:$true] %s217_s17 }
  0x20   : > { %s1664_s15 = scalar_select %p1363_p11, 1, 0 }
  0x21   : > { %p881_p12 = pneg %p1363_p11  ;;  %s1235_s19 = smov [#allocation12]  }
  0x22   : > { %s236_s20 = sshll.u32 %s1235_s19, 4  ;;  %s1666_s1 = sld [smem:[#allocation23_spill]]  ;;  %s1375_s20 = int_to_ptr.vmem [resolvable:$true] %s236_s20 }
  0x23   : > { %p1371_p13 = pnand %p881_p12, %p1338_p1 }
  0x25   : > { %p1022_p2 = pneg %p1371_p13 }
  0x28   : > { %s1020_s9 = scalar_lea.hbm %s1666_s1, 1024 }
  0x29   : > { %p1021_p0 = scmp.ne.s32.totalorder %s1666_s1, %s1020_s9  ;;  %p1027_p6 = scmp.lt.u32.totalorder %s1020_s9, %s1666_s1 }
  0x2b   : > { %p1023_p4 = pnand %p1022_p2, %p1021_p0 }
  0x2d   : > { %p1024_p5 = pneg %p1023_p4 }
  0x2f   : > { %p1029_p8 = pnand %p1027_p6, %p1024_p5 }
  0x31   : > { %1032 = shalt.err (!%p1029_p8)
}
  0x32   : > { %s1033_s19 = scalar_lea.vmem %s218_s17, 1024  ;;  %p1041_p7 = scmp.lt.s32.totalorder %s218_s17, %s218_s17 }
  0x33   : > { %p1034_p10 = scmp.ne.s32.totalorder %s218_s17, %s1033_s19  ;;  %p1042_p1 = scmp.lt.s32.totalorder %s1033_s19, %s1033_s19 }
  0x35   : > { %p1036_p12 = pnand %p1034_p10, %p1022_p2  ;;  %p1043_p3 = por %p1042_p1, %p1041_p7 }
  0x37   : > { %p1037_p9 = pneg %p1036_p12 }
  0x39   : > { %p1044_p11 = pnand %p1043_p3, %p1037_p9 }
  0x3b   : > { %1047 = shalt.err (!%p1044_p11)
}
  0x3c   : > { %s1644_s11 = smov 64   ;;  %s1645_s24 = smov 4  }
  0x3d   : > { %884 = dma.hbm_to_vmem [thread:$0]  (!%p1371_p13), %s1666_s1, 1024, %s218_s17, [#allocation11], %s1644_s11, %s1644_s11, %s1645_s24  }
  0x3e   : > { %s1667_s4 = sld [smem:[#allocation26_spill]] }
  0x44   : > { %s1048_s16 = scalar_lea.hbm %s1667_s4, 1024 }
  0x45   : > { %p1049_p1 = scmp.ne.s32.totalorder %s1667_s4, %s1048_s16  ;;  %p1055_p9 = scmp.lt.u32.totalorder %s1048_s16, %s1667_s4 }
  0x47   : > { %p1051_p3 = pnand %p1049_p1, %p1022_p2 }
  0x49   : > { %p1052_p7 = pneg %p1051_p3 }
  0x4b   : > { %p1057_p11 = pnand %p1055_p9, %p1052_p7 }
  0x4d   : > { %1060 = shalt.err (!%p1057_p11)
}
  0x4e   : > { %s1061_s17 = scalar_lea.vmem %s1375_s20, 1024  ;;  %p1069_p6 = scmp.lt.s32.totalorder %s1375_s20, %s1375_s20 }
  0x4f   : > { %p1062_p0 = scmp.ne.s32.totalorder %s1375_s20, %s1061_s17  ;;  %p1070_p8 = scmp.lt.s32.totalorder %s1061_s17, %s1061_s17 }
  0x51   : > { %p1064_p4 = pnand %p1062_p0, %p1022_p2  ;;  %p1071_p10 = por %p1070_p8, %p1069_p6 }
  0x53   : > { %p1065_p5 = pneg %p1064_p4 }
  0x55   : > { %p1072_p12 = pnand %p1071_p10, %p1065_p5 }
  0x57   : > { %1075 = shalt.err (!%p1072_p12)
}
  0x58   : > { %887 = dma.hbm_to_vmem [thread:$0]  (!%p1371_p13), %s1667_s4, 1024, %s1375_s20, [#allocation11], %s1644_s11, %s1644_s11, %s1645_s24  }
  0x59   : > { %s32_s13 = sadd.s32 1, %s1224_s29  ;;  %s35_s18 = sadd.s32 1, %s1228_s30 }
  0x5a   : > { %p33_p2 = scmp.ge.s32.totalorder %s32_s13, 2  ;;  %s39_s21 = ssub.s32 1, %s1228_s30 }
  0x5b   : > { %s40_s14 = smul.u32 %s1224_s29, %s39_s21  ;;  %s48_s8 = sadd.s32 1, %s1212_s26 }
  0x5c   : > { %s1701_s13 = smov (%p33_p2, %s32_s13), 0  ;;  %s1703_s18 = smov (!%p33_p2, %s35_s18), %s1228_s30 }
  0x5d   : > { %s41_s9 = sadd.s32 %s1228_s30, %s40_s14  ;;  %p55_p1 = scmp.ne.s32.totalorder %s1212_s26, %s1208_s25 }
  0x5e   : > { %p37_p3 = scmp.ge.s32.totalorder %s1703_s18, 2  ;;  %p56_p7 = scmp.eq.s32.totalorder %s1232_s7, 0 }
  0x5f   : > { %s176_s16 = smul.u32 %s1224_s29, %s1228_s30  ;;  %p898_p13 = scmp.lt.s32.totalorder %s1232_s7, 4 }
  0x60   : > { %s1705_s18 = smov (%p37_p3, %s1703_s18), 0  ;;  %p1447_p9 = por %p56_p7, %p55_p1 }
  0x61   : > { %s253_s19 = sand.u32 1, %s1212_s26   ;;  %s42_s17 = ssub.s32 1, %s1705_s18 }
  0x62   : > { %s177_s5 = smul.u32 %s1705_s18, %s1701_s13  ;;  %s772_s14 = sshll.u32 %s253_s19, 3 }
  0x63   : > { %s43_s6 = smul.u32 %s42_s17, %s1701_s13  ;;  %s809_s1 = sshll.u32 %s41_s9, 7 }
  0x64   : > { %s178_s21 = ssub.s32 %s176_s16, %s177_s5  ;;  %s1669_s4 = sadd.s32 1, %s1200_s23 }
  0x65   : > { %s44_s11 = sadd.s32 %s43_s6, %s1705_s18  ;;  %p179_p11 = scmp.eq.s32.totalorder %s178_s21, 0 }
  0x66   : > { %s45_s24 = ssub.s32 %s41_s9, %s44_s11  ;;  %s1468_s27 = scalar_lea.hbm %s1627_s0, %s809_s1 }
  0x67   : > { %p46_p0 = scmp.eq.s32.totalorder %s45_s24, 0  ;;  %s257_s16 = scalar_lea.vmem [#allocation7], %s772_s14 }
  0x68   : > { %s1460_s30 = scalar_select %p179_p11, %s1200_s23, %s1669_s4  }
  0x69   : > { %s1463_s29 = scalar_select %p46_p0, %s1212_s26, %s48_s8  }
  0x6a   : > { %s267_s17 = sshll.u32 %s257_s16, 4  ;;  %p1476_p4 = pnand %p898_p13, %p1447_p9  ;;  %s1470_s17 = int_to_ptr.vmem [resolvable:$true] %s267_s17 }
  0x6b   : > { %s1480_s11 = scalar_lea.sflag [#allocation8], %s253_s19  ;;  %s1076_s1 = scalar_lea.hbm %s1468_s27, 128 }
  0x6c   : > { %p1077_p5 = scmp.ne.s32.totalorder %s1468_s27, %s1076_s1  ;;  %p1078_p6 = pneg %p1476_p4 }
  0x6d   : > { %s1081_s24 = scalar_lea.hbm %s1627_s0, 256  ;;  %p1082_p12 = scmp.lt.u32.totalorder %s1468_s27, %s1627_s0 }
  0x6e   : > { %p1079_p8 = pnand %p1078_p6, %p1077_p5  ;;  %p1083_p2 = scmp.lt.u32.totalorder %s1081_s24, %s1076_s1 }
  0x6f   : > { %p1085_p3 = scmp.lt.u32.totalorder %s1076_s1, %s1468_s27 }
  0x70   : > { %p1080_p10 = pneg %p1079_p8  ;;  %p1084_p1 = por %p1083_p2, %p1082_p12 }
  0x72   : > { %p1086_p7 = por %p1085_p3, %p1084_p1 }
  0x74   : > { %p1087_p13 = pnand %p1086_p7, %p1080_p10 }
  0x76   : > { %1090 = shalt.err (!%p1087_p13)
}
  0x77   : > { %s1091_s20 = scalar_lea.vmem %s1470_s17, 128  ;;  %s1238_s19 = smov [#allocation7]  }
  0x78   : > { %p1092_p9 = scmp.ne.s32.totalorder %s1470_s17, %s1091_s20  ;;  %s1096_s5 = sshll.u32 %s1238_s19, 4  ;;  %s1097_s5 = int_to_ptr.vmem [resolvable:$false] %s1096_s5 }
  0x79   : > { %s1098_s6 = scalar_lea.vmem %s1097_s5, 256  ;;  %p1099_p5 = scmp.lt.s32.totalorder %s1470_s17, %s1097_s5 }
  0x7a   : > { %p1094_p11 = pnand %p1092_p9, %p1078_p6  ;;  %p1100_p8 = scmp.lt.s32.totalorder %s1098_s6, %s1091_s20 }
  0x7c   : > { %p1095_p0 = pneg %p1094_p11  ;;  %p1101_p12 = por %p1100_p8, %p1099_p5 }
  0x7e   : > { %p1102_p2 = pnand %p1101_p12, %p1095_p0 }
  0x80   : > { %1105 = shalt.err (!%p1102_p2)
}
  0x81   : > { %s1671_s21 = smov 4   ;;  %s1672_s14 = smov 64  }
  0x82   : > { %891 = dma.hbm_to_vmem [thread:$0]  (!%p1476_p4), %s1468_s27, 128, %s1470_s17, %s1480_s11, %s1672_s14, %s1672_s14, %s1671_s21  }
  0x83   : > { %p1673_p6 = scmp.ne.s32.totalorder %s1664_s15, 0 }
  0x84   : > { %s281_s16 = sand.u32 (!%p1673_p6), 1, %s1208_s25   ;;  %p1674_p10 = scmp.ne.s32.totalorder (!%p1673_p6), %s1659_s12, 0 }
  0x85   : > { %279 = sbr.rel (%p1673_p6) target bundleno = 748 (0x2ec), region = 44  ;;  %s1514_s1 = sshll.u32 (!%p1673_p6), %s281_s16, 3 }
  0x86   : > { %s282_s2 = scalar_lea.sflag (!%p1673_p6), [#allocation8], %s281_s16  ;;  %s285_s3 = scalar_lea.vmem (!%p1673_p6), [#allocation7], %s1514_s1 }
  0x8c   : > { %1179 = dma.done.wait (%p1674_p10), %s282_s2, 128  }
  0x8d   : > { %1181 = vsyncadd (%p1674_p10), %s282_s2, 4294967168  ;;  %p1675_p1 = scmp.ne.s32.totalorder %s1658_s10, 0 }
  0x8f   : > { %1183 = dma.done.wait (%p1675_p1), [#allocation11], 2048  }
  0x90   : > { %1185 = vsyncadd (%p1675_p1), [#allocation11], 4294965248  ;;  %s1676_s27 = sld [smem:[#allocation18_spill]]  ;;  %s319_s15 = sand.u32 1, %s1196_s22  }
  0x91   : > { %p329_p4 = scmp.eq.s32.totalorder %s1220_s28, 0  ;;  %s779_s17 = sshll.u32 %s319_s15, 4 }
  0x92   : > { %s1532_s12 = scalar_lea.vmem [#allocation13], %s779_s17 }
  0x96   : > { %p330_p3 = scmp.eq.s32.totalorder %s1676_s27, 0 }
  0x98   : > { %p331_p7 = pnand %p330_p3, %p329_p4 }
  0x99   : > { %v1239_v0 = vmov (!%p331_p7), 0.0  }
  0x9a   : > { %334 = sbr.rel (%p331_p7) target bundleno = 161 (0xa1), region = 60  ;;  %335 = vst [vmem:[#allocation2] sm:$0x1] (!%p331_p7), %v1239_v0  ;;  %336 = vst [vmem:[#allocation3] sm:$0x1] (!%p331_p7), %v1239_v0 }
  0xa1 PF: > { %p780_p13 = scmp.ne.s32.totalorder %s1220_s28, 0 }
  0xa2   : > { %v1001_v1 = vld [vmem:[#allocation10] sm:$0xff] (!%p780_p13)   ;;  %v1240_v2 = vmov (!%p780_p13), 0.0   ;;  %v1002_v3 = vld [vmem:[#allocation10 + $0x8] sm:$0xff] (!%p780_p13)   ;;  %vm1241_vm0 = vmmov (!%p780_p13), 0   ;;  %v1003_v4 = vld [vmem:[#allocation10 + $0x10] sm:$0xff] (!%p780_p13)   ;;  %s1677_s10 = sld [smem:[#allocation18_spill]] (!%p780_p13) }
  0xa3   : > { %339 = sbr.rel (%p780_p13) target bundleno = 428 (0x1ac), region = 64  ;;  %829 = vmatprep.subr.bf16.mxu0 (!%p780_p13), %v1240_v2  ;;  %845 = vmatprep.mubr.msk.bf16.mxu0 (!%p780_p13), %vm1241_vm0, %v1240_v2  ;;  %v1004_v5 = vld [vmem:[#allocation10 + $0x18] sm:$0xff] (!%p780_p13)   ;;  %v1005_v6 = vld [vmem:[#allocation10 + $0x20] sm:$0xff] (!%p780_p13)   ;;  %v1006_v7 = vld [vmem:[#allocation10 + $0x28] sm:$0xff] (!%p780_p13)  }
  0xa4   : > { %830 = vmatpush3.bf16.msra.mxu0 (!%p780_p13), %v1001_v1  ;;  %v1007_v8 = vld [vmem:[#allocation10 + $0x30] sm:$0xff] (!%p780_p13)   ;;  %v1008_v9 = vld [vmem:[#allocation10 + $0x38] sm:$0xff] (!%p780_p13)   ;;  %v457_v28 = vld [vmem:[#allocation2] sm:$0x1] (!%p780_p13) }
  0xa5   : > { %831 = vmatprep.subr.bf16.mxu0 (!%p780_p13), %v1240_v2  ;;  %v1009_v10 = vld [vmem:[%s285_s3] sm:$0xff] (!%p780_p13)   ;;  %v467_v31 = vld [vmem:[#allocation3] sm:$0x1] (!%p780_p13) }
  0xa8   : > { %832 = vmatpush3.bf16.msra.mxu0 (!%p780_p13), %v1002_v3  ;;  %s790_s4 = sshll.u32 (!%p780_p13), %s1677_s10, 4 }
  0xa9   : > { %833 = vmatprep.subr.bf16.mxu0 (!%p780_p13), %v1240_v2  ;;  %s454_s11 = scalar_lea.vmem (!%p780_p13), [#allocation6], %s790_s4 }
  0xac   : > { %834 = vmatpush3.bf16.msra.mxu0 %v1003_v4 }
  0xad   : > { %835 = vmatprep.subr.bf16.mxu0 %v1240_v2 }
  0xb0   : > { %836 = vmatpush3.bf16.msra.mxu0 %v1004_v5 }
  0xb1   : > { %837 = vmatprep.subr.bf16.mxu0 %v1240_v2 }
  0xb4   : > { %838 = vmatpush3.bf16.msra.mxu0 %v1005_v6 }
  0xb5   : > { %839 = vmatprep.subr.bf16.mxu0 %v1240_v2 }
  0xb8   : > { %840 = vmatpush3.bf16.msra.mxu0 %v1006_v7 }
  0xb9   : > { %841 = vmatprep.subr.bf16.mxu0 %v1240_v2 }
  0xbc   : > { %842 = vmatpush3.bf16.msra.mxu0 %v1007_v8 }
  0xbd   : > { %843 = vmatprep.subr.bf16.mxu0 %v1240_v2 }
  0xc0   : > { %844 = vmatpush3.bf16.msra.mxu0 %v1008_v9 }
  0xc3   : > { %846 = vmatmul.mubr.bf16.vlgmr.msra.gmra.mrb[0].mxu0 %v1009_v10 }
 0x196   : > { %v446_v11 = vpop.f32.mrb[0].mxu0 }
 0x197   : > { %455 = vst [vmem:[%s454_s11] sm:$0xff] %v446_v11  ;;  %v847_v12 = vpop.f32.mrb[1].mxu0  ;;  %v468_v14 = vmul.f32 %v446_v11, %v446_v11 }
 0x198   : > { %v449_v13 = vpop.f32.mrb[2].mxu0 }
 0x199   : > { %456 = vst [vmem:[%s454_s11 + $0x8] sm:$0xff] %v449_v13  ;;  %v458_v15 = vadd.f32 %v449_v13, %v446_v11  ;;  %v469_v16 = vmul.f32 %v449_v13, %v449_v13  ;;  %v848_v17 = vpop.f32.mrb[3].mxu0 }
 0x19b   : > { %v459_v18 = vrot.slane %v458_v15, 4  ;;  %v470_v19 = vadd.f32 %v469_v16, %v468_v14 }
 0x19d   : > { %v460_v20 = vadd.f32 %v459_v18, %v458_v15  ;;  %v471_v21 = vrot.slane %v470_v19, 4 }
 0x19f   : > { %v461_v22 = vrot.slane %v460_v20, 2  ;;  %v472_v23 = vadd.f32 %v471_v21, %v470_v19 }
 0x1a1   : > { %v462_v24 = vadd.f32 %v461_v22, %v460_v20  ;;  %v473_v25 = vrot.slane %v472_v23, 2 }
 0x1a3   : > { %v463_v26 = vrot.slane %v462_v24, 1  ;;  %v474_v27 = vadd.f32 %v473_v25, %v472_v23 }
 0x1a5   : > { %v464_v29 = vadd.f32 %v463_v26, %v462_v24  ;;  %v475_v30 = vrot.slane %v474_v27, 1 }
 0x1a7   : > { %v465_v32 = vadd.f32 %v464_v29, %v457_v28  ;;  %v476_v33 = vadd.f32 %v475_v30, %v474_v27 }
 0x1a9   : > { %466 = vst [vmem:[#allocation2] sm:$0x1] %v465_v32  ;;  %v477_v34 = vadd.f32 %v476_v33, %v467_v31 }
 0x1ab   : > { %478 = vst [vmem:[#allocation3] sm:$0x1] %v477_v34 }
 0x1ac PF: > { %s1678_s24 = sld [smem:[#allocation18_spill]] }
 0x1b2   : > { %p479_p9 = scmp.eq.s32.totalorder %s1678_s24, 1 }
 0x1b4   : > { %p480_p11 = pnand %p479_p9, %p329_p4 }
 0x1b5   : > { %v484_v35 = vld [vmem:[#allocation2] sm:$0x1] (!%p480_p11)  ;;  %v486_v36 = vld [vmem:[#allocation3] sm:$0x1] (!%p480_p11)  ;;  %s1679_s20 = sld [smem:[#allocation24_spill]] (!%p480_p11)  ;;  %s1680_s6 = sld [smem:[#allocation25_spill]] (!%p480_p11) }
 0x1b6   : > { %483 = sbr.rel (%p480_p11) target bundleno = 466 (0x1d2), region = 68  ;;  %v485_v37 = vmul.f32 (!%p480_p11), 0.03125, %v484_v35  ;;  %v487_v38 = vmul.f32 (!%p480_p11), 0.03125, %v486_v36 }
 0x1b8   : > { %v488_v39 = vmul.f32 (!%p480_p11), %v485_v37, %v485_v37 }
 0x1ba   : > { %v489_v40 = vsub.f32 (!%p480_p11), %v487_v38, %v488_v39 }
 0x1bb   : > { %v493_v43 = vld [vmem:[%s1679_s20] sm:$0x1] (!%p480_p11) }
 0x1bc   : > { %v490_v41 = vmax.f32 (!%p480_p11), %v489_v40, 0.0  ;;  %v496_v46 = vld [vmem:[%s1680_s6] sm:$0x1] (!%p480_p11) }
 0x1be   : > { %v491_v42 = vadd.f32 1e-05, %v490_v41 }
 0x1c0   : > { %1010 = vrsqrt.f32 %v491_v42 }
 0x1ca   : > { %v1011_v44 = vpop.eup %1010 }
 0x1cb   : > { %v494_v45 = vmul.f32 %v1011_v44, %v493_v43 }
 0x1cd   : > { %495 = vst [vmem:[#allocation4] sm:$0x1] %v494_v45  ;;  %v497_v47 = vmul.f32 %v494_v45, %v485_v37 }
 0x1cf   : > { %v498_v48 = vsub.f32 %v496_v46, %v497_v47 }
 0x1d1   : > { %499 = vst [vmem:[#allocation5] sm:$0x1] %v498_v48 }
 0x1d2 PF: > { %p791_p0 = scmp.ne.s32.totalorder %s1220_s28, 1 }
 0x1d3   : > { %v1012_v49 = vld [vmem:[#allocation12] sm:$0xff] (!%p791_p0)   ;;  %s1681_s21 = sld [smem:[#allocation18_spill]] (!%p791_p0)  ;;  %v1242_v50 = vmov (!%p791_p0), 0.0   ;;  %v1013_v51 = vld [vmem:[#allocation12 + $0x8] sm:$0xff] (!%p791_p0)   ;;  %vm1243_vm1 = vmmov (!%p791_p0), 0   ;;  %v1014_v52 = vld [vmem:[#allocation12 + $0x10] sm:$0xff] (!%p791_p0)  }
 0x1d4   : > { %503 = sbr.rel (%p791_p0) target bundleno = 717 (0x2cd), region = 72  ;;  %849 = vmatprep.subr.bf16.mxu0 (!%p791_p0), %v1242_v50  ;;  %865 = vmatprep.mubr.msk.bf16.mxu0 (!%p791_p0), %vm1243_vm1, %v1242_v50  ;;  %v1015_v53 = vld [vmem:[#allocation12 + $0x18] sm:$0xff] (!%p791_p0)   ;;  %v1016_v54 = vld [vmem:[#allocation12 + $0x20] sm:$0xff] (!%p791_p0)   ;;  %v793_v57 = vld [vmem:[#allocation4] ss:$0 sm:$0xff] (!%p791_p0)  ;;  %s1682_s3 = sld [smem:[#allocation27_spill]] (!%p791_p0) }
 0x1d5   : > { %850 = vmatpush3.bf16.msra.mxu0 (!%p791_p0), %v1012_v49  ;;  %v1017_v60 = vld [vmem:[#allocation12 + $0x28] sm:$0xff] (!%p791_p0)   ;;  %v1018_v0 = vld [vmem:[#allocation12 + $0x30] sm:$0xff] (!%p791_p0)   ;;  %v1019_v3 = vld [vmem:[#allocation12 + $0x38] sm:$0xff] (!%p791_p0)  }
 0x1d6   : > { %851 = vmatprep.subr.bf16.mxu0 (!%p791_p0), %v1242_v50 }
 0x1d8   : > { %v794_v61 = vld [vmem:[#allocation5] ss:$0 sm:$0xff] (!%p791_p0) }
 0x1d9   : > { %852 = vmatpush3.bf16.msra.mxu0 (!%p791_p0), %v1013_v51  ;;  %s792_s14 = sshll.u32 (!%p791_p0), %s1681_s21, 4 }
 0x1da   : > { %853 = vmatprep.subr.bf16.mxu0 (!%p791_p0), %v1242_v50  ;;  %s505_s16 = scalar_lea.vmem (!%p791_p0), [#allocation6], %s792_s14  ;;  %v795_v5 = vld [vmem:[%s1682_s3] ss:$0 sm:$0xff] (!%p791_p0) }
 0x1db   : > { %v506_v55 = vld [vmem:[%s505_s16] sm:$0xff]  ;;  %v507_v56 = vld [vmem:[%s505_s16 + $0x8] sm:$0xff] }
 0x1dc   : > { %v515_v58 = vmul.f32 %v793_v57, %v506_v55  ;;  %v516_v59 = vmul.f32 %v793_v57, %v507_v56 }
 0x1dd   : > { %854 = vmatpush3.bf16.msra.mxu0 %v1014_v52 }
 0x1de   : > { %855 = vmatprep.subr.bf16.mxu0 %v1242_v50  ;;  %v524_v62 = vadd.f32 %v794_v61, %v515_v58  ;;  %v525_v63 = vadd.f32 %v794_v61, %v516_v59 }
 0x1e0   : > { %v526_v1 = vmax.f32 %v524_v62, 0.0  ;;  %v527_v2 = vmax.f32 %v525_v63, 0.0 }
 0x1e1   : > { %856 = vmatpush3.bf16.msra.mxu0 %v1015_v53 }
 0x1e2   : > { %857 = vmatprep.subr.bf16.mxu0 %v1242_v50  ;;  %v528_v4 = vpack.c.bf16 %v527_v2, %v526_v1 }
 0x1e5   : > { %858 = vmatpush3.bf16.msra.mxu0 %v1016_v54 }
 0x1e6   : > { %859 = vmatprep.subr.bf16.mxu0 %v1242_v50 }
 0x1e9   : > { %860 = vmatpush3.bf16.msra.mxu0 %v1017_v60 }
 0x1ea   : > { %861 = vmatprep.subr.bf16.mxu0 %v1242_v50 }
 0x1ed   : > { %862 = vmatpush3.bf16.msra.mxu0 %v1018_v0 }
 0x1ee   : > { %863 = vmatprep.subr.bf16.mxu0 %v1242_v50 }
 0x1f1   : > { %864 = vmatpush3.bf16.msra.mxu0 %v1019_v3 }
 0x1f4   : > { %866 = vmatmul.mubr.bf16.vlgmr.msra.gmra.mrb[0].mxu0 %v528_v4 }
 0x2c7   : > { %v634_v6 = vpop.f32.mrb[0].mxu0 }
 0x2c8   : > { %v635_v7 = vadd.f32 %v795_v5, %v634_v6  ;;  %v867_v8 = vpop.f32.mrb[1].mxu0 }
 0x2c9   : > { %v637_v9 = vpop.f32.mrb[2].mxu0 }
 0x2ca   : > { %641 = vst [vmem:[%s1532_s12] sm:$0xff] %v635_v7  ;;  %v638_v10 = vadd.f32 %v795_v5, %v637_v9  ;;  %v868_v11 = vpop.f32.mrb[3].mxu0 }
 0x2cc   : > { %642 = vst [vmem:[%s1532_s12 + $0x8] sm:$0xff] %v638_v10 }
 0x2cd PF: > { %s1683_s27 = sld [smem:[#allocation18_spill]]  ;;  %s1684_s17 = sld [smem:[#allocation21_spill]] }
 0x2ce   : > { %s658_s4 = sshll.u32 %s1532_s12, 4  ;;  %s1685_s9 = sld [smem:[#allocation28_spill]]  ;;  %s1557_s4 = int_to_ptr.vmem [resolvable:$true] %s658_s4 }
 0x2cf   : > { %s1566_s19 = scalar_lea.sflag [#allocation9], %s319_s15  ;;  %s1106_s5 = scalar_lea.vmem %s1557_s4, 256 }
 0x2d0   : > { %p1107_p5 = scmp.ne.s32.totalorder %s1557_s4, %s1106_s5 }
 0x2d3   : > { %s651_s10 = smul.u32 %s1683_s27, %s1220_s28  ;;  %p1686_p8 = scmp.ne.s32.totalorder %s1684_s17, 0 }
 0x2d4   : > { %s1244_s28 = smov [#allocation13]  }
 0x2d5   : > { %s810_s11 = sshll.u32 %s651_s10, 8  ;;  %p1108_p12 = pnand %p1107_p5, %p1686_p8 }
 0x2d6   : > { %s1562_s20 = scalar_lea.hbm %s1685_s9, %s810_s11  ;;  %s1110_s12 = sshll.u32 %s1244_s28, 4  ;;  %s1111_s12 = int_to_ptr.vmem [resolvable:$false] %s1110_s12 }
 0x2d7   : > { %p1109_p2 = pneg %p1108_p12  ;;  %s1112_s6 = scalar_lea.vmem %s1111_s12, 512 }
 0x2d8   : > { %p1113_p6 = scmp.lt.s32.totalorder %s1557_s4, %s1111_s12  ;;  %p1114_p10 = scmp.lt.s32.totalorder %s1112_s6, %s1106_s5 }
 0x2da   : > { %p1115_p1 = por %p1114_p10, %p1113_p6 }
 0x2dc   : > { %p1116_p4 = pnand %p1115_p1, %p1109_p2 }
 0x2de   : > { %1119 = shalt.err (!%p1116_p4)
}
 0x2df   : > { %s1120_s15 = scalar_lea.hbm %s1562_s20, 256  ;;  %s1124_s16 = scalar_lea.hbm %s1685_s9, 512 }
 0x2e0   : > { %p1121_p3 = scmp.ne.s32.totalorder %s1562_s20, %s1120_s15  ;;  %p1125_p9 = scmp.lt.u32.totalorder %s1562_s20, %s1685_s9 }
 0x2e1   : > { %p1126_p11 = scmp.lt.u32.totalorder %s1124_s16, %s1120_s15  ;;  %p1128_p5 = scmp.lt.u32.totalorder %s1120_s15, %s1562_s20 }
 0x2e2   : > { %p1122_p7 = pnand %p1121_p3, %p1686_p8 }
 0x2e3   : > { %p1127_p0 = por %p1126_p11, %p1125_p9 }
 0x2e4   : > { %p1123_p13 = pneg %p1122_p7 }
 0x2e5   : > { %p1129_p12 = por %p1128_p5, %p1127_p0 }
 0x2e7   : > { %p1130_p2 = pnand %p1129_p12, %p1123_p13 }
 0x2e9   : > { %1133 = shalt.err (!%p1130_p2)
}
 0x2ea   : > { %s1245_s3 = smov 128   ;;  %s1246_s27 = smov 8  }
 0x2eb   : > { %879 = dma.vmem_to_hbm [thread:$0]  (%p1686_p8), %s1557_s4, 256, %s1562_s20, %s1566_s19, %s1245_s3, %s1245_s3, %s1246_s27  }
 0x2ec PF: > { %s1687_s10 = sld [smem:[#allocation17_spill]]  ;;  %s1688_s11 = sld [smem:[#allocation22_spill]] }
 0x2ed   : > { %p901_p6 = scmp.ge.s32.totalorder %s1232_s7, 2 }
 0x2f2   : > { %s673_s24 = sand.u32 1, %s1687_s10   ;;  %p1689_p10 = scmp.ne.s32.totalorder %s1688_s11, 0 }
 0x2f3   : > { %s674_s8 = scalar_lea.sflag [#allocation9], %s673_s24 }
 0x2f4   : > { %p893_p1 = pnand %p901_p6, %p1689_p10 }
 0x2f6   : > { %1187 = dma.done.wait (!%p893_p1), %s674_s8, 256  }
 0x2f7   : > { %1189 = vsyncadd (!%p893_p1), %s674_s8, 4294967040  ;;  %s23_s7 = sadd.s32 1, %s1232_s7   ;;  %s1690_s27 = sld [smem:[#allocation19_spill]] }
 0x2f8   : > { %p20_p4 = scmp.ge.s32.totalorder %s23_s7, 6   ;;  %s1691_s28 = sld [smem:[#allocation20_spill]] }
 0x2f9   : > { %s1692_s21 = smov %s1196_s22  ;;  %s1693_s22 = smov %s1200_s23 }
 0x2fa   : > { %s1694_s23 = smov %s1460_s30  ;;  %s1695_s24 = smov %s1208_s25 }
 0x2fb   : > { %s1696_s25 = smov %s1212_s26  ;;  %s1697_s26 = smov %s1463_s29 }
 0x2fc   : > { %s1698_s29 = smov %s1701_s13  ;;  %s1699_s30 = smov %s1705_s18 }
 0x2fd   :  { %22 = sbr.rel (!%p20_p4) target bundleno = 17 (0x11), region = 115 }
 0x304   :  { %679 = vsyncpa [#allocation8], 1 }
 0x305   :  { %681 = vsyncpa [#allocation8 + $0x1], 1 }
 0x306   :  { %682 = vsyncpa [#allocation11], 1 }
 0x307   :  { %683 = vsyncpa [#allocation9], 1 }
 0x308   :  { %685 = vsyncpa [#allocation9 + $0x1], 1 }

</bundles_post_ra>
